<compile_context>
chip_gen: v7x
topology: tpu7x:2x2x1
jax: 0.10.0
libtpu: 0.0.40
codegen_flags: <defaults>
</compile_context>

<pallas_src>
import functools

import jax
import jax.numpy as jnp
from jax.experimental import pallas as pl
from jax.experimental.pallas import tpu as pltpu

SELU_ALPHA = 1.6732632423543772
SELU_SCALE = 1.0507009873554805
BN_EPS = 1e-5

K = 3  # conv kernel size


def _dense_layer_kernel(x_ref, w_ref, shift_ref, o_ref, *, c_in, seq_len):
    """Fused conv1d (+folded BN) + SELU + channel-concat for the whole batch.

    x_ref:     (C_in_pad, NL_pad)        batch folded into lanes, zero-padded rows/lanes
    w_ref:     (C_out, K*C_in_pad)       BN-folded conv weight, tap-major contraction
    shift_ref: (C_out, 1)                BN-folded bias/shift
    o_ref:     (C_in + C_out, NL_pad)    output rows: [x ; selu(bn(conv(x)))]
    """
    x = x_ref[...]                                   # (C_in_pad, NL_pad) f32
    c_in_pad, nl_pad = x.shape

    # Lane position within each length-L batch segment (lane index = n*L + l).
    col = jax.lax.broadcasted_iota(jnp.int32, (c_in_pad, nl_pad), 1) % seq_len

    # Shifted taps via XLU roll; zero the column that wrapped across a segment
    # boundary -> effective zero padding of 1 per batch element, no cross-batch leak.
    x_prev = jnp.where(col == 0, 0.0, pltpu.roll(x, shift=1, axis=1))
    x_next = jnp.where(col == seq_len - 1, 0.0,
                       pltpu.roll(x, shift=nl_pad - 1, axis=1))   # == roll by -1

    # im2col-lite: K taps stacked along the 8-aligned contraction (sublane) axis.
    x_stack = jnp.concatenate([x_prev, x, x_next], axis=0)        # (K*C_in_pad, NL_pad)

    # Single weight-stationary MXU matmul for the whole batch, f32 accumulation.
    y = jnp.dot(w_ref[...], x_stack, preferred_element_type=jnp.float32)  # (C_out, NL_pad)
    y = y + shift_ref[...]                                        # folded conv-bias + BN

    # SELU
    y = SELU_SCALE * jnp.where(y > 0, y, SELU_ALPHA * (jnp.exp(y) - 1.0))

    # dropout: F.dropout with training=False is identity (drop_rate unused here)

    # Fused concat([x, new_features], channel axis): one full-ref lane-dense store.
    o_ref[...] = jnp.concatenate([x[:c_in, :], y], axis=0).astype(o_ref.dtype)


def dense_layer_forward(x_ncl, w, b, gamma, beta, run_mean, run_var,
                        drop_rate=0.0, training=False):
    """x_ncl: (N, C_in, L) float32. Returns (N, C_in + C_out, L)."""
    # TODO(synk): training=True dropout not implemented; eval-mode (identity) only.
    n, c_in, l = x_ncl.shape
    c_out = w.shape[0]

    c_in_pad = -(-c_in // 8) * 8            # round channel slabs up to 8 sublanes
    nl = n * l
    nl_pad = -(-nl // 128) * 128            # lane axis rounded up to a 128 multiple

    # --- parameter folding (tiny, done once in the wrapper) ---
    scale = gamma / jnp.sqrt(run_var + BN_EPS)                       # (C_out,)
    w_eff = w.astype(jnp.float32) * scale[:, None, None]             # (C_out, C_in, K)
    w_pad = jnp.pad(w_eff, ((0, 0), (0, c_in_pad - c_in), (0, 0)))   # (C_out, 8, K)
    # tap-major contraction layout matching [x_prev ; x ; x_next] stacking
    w2d = jnp.transpose(w_pad, (0, 2, 1)).reshape(c_out, K * c_in_pad)
    shift = ((b - run_mean) * scale + beta).reshape(c_out, 1).astype(jnp.float32)

    # --- layout plumbing: fold batch into the lane axis, pad to (8, 128) tiles ---
    x2d = jnp.transpose(x_ncl.astype(jnp.float32), (1, 0, 2)).reshape(c_in, nl)
    x2d = jnp.pad(x2d, ((0, c_in_pad - c_in), (0, nl_pad - nl)))     # (C_in_pad, NL_pad)

    kernel = functools.partial(_dense_layer_kernel, c_in=c_in, seq_len=l)

    out2d = pl.pallas_call(
        kernel,
        out_shape=jax.ShapeDtypeStruct((c_in + c_out, nl_pad), jnp.float32),
        in_specs=[
            pl.BlockSpec((c_in_pad, nl_pad), lambda: (0, 0)),
            pl.BlockSpec((c_out, K * c_in_pad), lambda: (0, 0)),
            pl.BlockSpec((c_out, 1), lambda: (0, 0)),
        ],
        out_specs=pl.BlockSpec((c_in + c_out, nl_pad), lambda: (0, 0)),
        cost_estimate=pl.CostEstimate(
            flops=2 * n * c_out * K * c_in * l,
            transcendentals=n * c_out * l,
            bytes_accessed=4 * (n * c_in * l + c_out * K * c_in + c_out
                                + n * (c_in + c_out) * l),
        ),
    )(x2d, w2d, shift)

    # undo layout plumbing: (C_total, N*L) -> (N, C_total, L)
    out = out2d[:, :nl].reshape(c_in + c_out, n, l).transpose(1, 0, 2)
    return out.astype(x_ncl.dtype)


def _reference(x_ncl, w, b, gamma, beta, run_mean, run_var):
    """Pure-jnp reference (unfolded BN), same effective-padding-1 semantics."""
    n, c_in, l = x_ncl.shape
    c_out = w.shape[0]
    x_pad = jnp.pad(x_ncl, ((0, 0), (0, 0), (1, 1)))                 # (N, C_in, L+2)
    y = jnp.zeros((n, c_out, l), jnp.float32)
    for k in range(K):
        y = y + jnp.einsum('oc,ncl->nol', w[:, :, k], x_pad[:, :, k:k + l])
    y = y + b[None, :, None]
    y = ((y - run_mean[None, :, None])
         / jnp.sqrt(run_var[None, :, None] + BN_EPS)
         * gamma[None, :, None] + beta[None, :, None])
    y = SELU_SCALE * jnp.where(y > 0, y, SELU_ALPHA * (jnp.exp(y) - 1.0))
    return jnp.concatenate([x_ncl, y], axis=1)


if __name__ == "__main__":
    key = jax.random.PRNGKey(0)
    kx, kw, kb, kg, kbt, km, kv = jax.random.split(key, 7)

    N, C_IN, C_OUT, L = 2, 4, 8, 16
    x = jax.random.normal(kx, (N, C_IN, L), dtype=jnp.float32)

    # Conv1d(C_IN, C_OUT, kernel_size=3) parameters (PyTorch shape: (C_out, C_in, K))
    fan_in = C_IN * K
    bound = 1.0 / (fan_in ** 0.5)
    w = jax.random.uniform(kw, (C_OUT, C_IN, K), minval=-bound, maxval=bound,
                           dtype=jnp.float32)
    b = jax.random.uniform(kb, (C_OUT,), minval=-bound, maxval=bound,
                           dtype=jnp.float32)

    # BatchNorm1d(C_OUT) parameters / running stats (eval mode)
    gamma = 1.0 + 0.1 * jax.random.normal(kg, (C_OUT,), dtype=jnp.float32)
    beta = 0.1 * jax.random.normal(kbt, (C_OUT,), dtype=jnp.float32)
    run_mean = 0.1 * jax.random.normal(km, (C_OUT,), dtype=jnp.float32)
    run_var = jnp.abs(1.0 + 0.1 * jax.random.normal(kv, (C_OUT,), dtype=jnp.float32))

    out = dense_layer_forward(x, w, b, gamma, beta, run_mean, run_var,
                              drop_rate=0.5, training=False)
    out = jax.block_until_ready(out)

    ref = _reference(x, w, b, gamma, beta, run_mean, run_var)
    assert out.shape == (N, C_IN + C_OUT, L), out.shape
    assert jnp.allclose(out, ref, atol=1e-5, rtol=1e-5), "mismatch vs reference"

    print("KERNEL_OK")
</pallas_src>

<mosaic_0001>
module attributes {stable_mosaic.version = 11 : i64} {
  func.func @_dense_layer_kernel(%arg0: memref<8x128xf32, #tpu.memory_space<vmem>>, %arg1: memref<8x24xf32, #tpu.memory_space<vmem>>, %arg2: memref<8x1xf32, #tpu.memory_space<vmem>>, %arg3: memref<12x128xf32, #tpu.memory_space<vmem>>) attributes {dimension_semantics = [], scalar_prefetch = 0 : i64, scratch_operands = 0 : i64, tpu.core_type = #tpu.core_type<tc>} {
    %c0 = arith.constant 0 : index
    %c0_0 = arith.constant 0 : index
    %0 = vector.load %arg0[%c0, %c0_0] : memref<8x128xf32, #tpu.memory_space<vmem>>, vector<8x128xf32>
    %1 = tpu.iota {dimensions = array<i32: 1>} : vector<8x128xi32>
    %c16_i32 = arith.constant 16 : i32
    %c0_i32 = arith.constant 0 : i32
    %2 = arith.cmpi eq, %c16_i32, %c0_i32 : i32
    %c1_i32 = arith.constant 1 : i32
    %3 = arith.select %2, %c1_i32, %c16_i32 : i32
    %4 = vector.broadcast %3 : i32 to vector<8x128xi32>
    %5 = arith.remsi %1, %4 : vector<8x128xi32>
    %c0_i32_1 = arith.constant 0 : i32
    %6 = vector.broadcast %c0_i32_1 : i32 to vector<8x128xi32>
    %7 = arith.cmpi ne, %5, %6 : vector<8x128xi32>
    %c0_i32_2 = arith.constant 0 : i32
    %8 = vector.broadcast %c0_i32_2 : i32 to vector<8x128xi32>
    %9 = arith.cmpi slt, %5, %8 : vector<8x128xi32>
    %c0_i32_3 = arith.constant 0 : i32
    %10 = arith.cmpi slt, %3, %c0_i32_3 : i32
    %11 = vector.broadcast %10 : i1 to vector<8x128xi1>
    %12 = vector.broadcast %11 : vector<8x128xi1> to vector<8x128xi1>
    %13 = arith.xori %9, %12 : vector<8x128xi1>
    %14 = arith.andi %13, %7 : vector<8x128xi1>
    %15 = vector.broadcast %3 : i32 to vector<8x128xi32>
    %16 = arith.addi %5, %15 : vector<8x128xi32>
    %17 = arith.select %14, %16, %5 : vector<8x128xi1>, vector<8x128xi32>
    %c0_i32_4 = arith.constant 0 : i32
    %18 = vector.broadcast %c0_i32_4 : i32 to vector<8x128xi32>
    %19 = arith.cmpi eq, %17, %18 : vector<8x128xi32>
    %c1_i32_5 = arith.constant 1 : i32
    %20 = tpu.dynamic_rotate %0 by %c1_i32_5 dim 1 : vector<8x128xf32>, i32 -> vector<8x128xf32>
    %cst = arith.constant 0.000000e+00 : f32
    %21 = vector.broadcast %cst : f32 to vector<8x128xf32>
    %22 = arith.select %19, %21, %20 : vector<8x128xi1>, vector<8x128xf32>
    %c15_i32 = arith.constant 15 : i32
    %23 = vector.broadcast %c15_i32 : i32 to vector<8x128xi32>
    %24 = arith.cmpi eq, %17, %23 : vector<8x128xi32>
    %c127_i32 = arith.constant 127 : i32
    %25 = tpu.dynamic_rotate %0 by %c127_i32 dim 1 : vector<8x128xf32>, i32 -> vector<8x128xf32>
    %cst_6 = arith.constant 0.000000e+00 : f32
    %26 = vector.broadcast %cst_6 : f32 to vector<8x128xf32>
    %27 = arith.select %24, %26, %25 : vector<8x128xi1>, vector<8x128xf32>
    %28 = tpu.concatenate %22, %0, %27 in 0 : vector<8x128xf32>, vector<8x128xf32>, vector<8x128xf32> -> vector<24x128xf32>
    %c0_7 = arith.constant 0 : index
    %c0_8 = arith.constant 0 : index
    %29 = vector.load %arg1[%c0_7, %c0_8] : memref<8x24xf32, #tpu.memory_space<vmem>>, vector<8x24xf32>
    %cst_9 = arith.constant dense<0.000000e+00> : vector<8x128xf32>
    %30 = tpu.matmul %29, %28, %cst_9 {dimension_numbers = #tpu.dot_dimension_numbers<[1], [0], [0], [1], [0, 0, 1, 1], [], []>} : vector<8x24xf32>, vector<24x128xf32>, vector<8x128xf32> -> vector<8x128xf32>
    %c0_10 = arith.constant 0 : index
    %c0_11 = arith.constant 0 : index
    %31 = vector.load %arg2[%c0_10, %c0_11] : memref<8x1xf32, #tpu.memory_space<vmem>>, vector<8x1xf32>
    %32 = vector.broadcast %31 : vector<8x1xf32> to vector<8x128xf32>
    %33 = arith.addf %30, %32 : vector<8x128xf32>
    %cst_12 = arith.constant 0.000000e+00 : f32
    %34 = vector.broadcast %cst_12 : f32 to vector<8x128xf32>
    %35 = arith.cmpf ogt, %33, %34 : vector<8x128xf32>
    %36 = math.exp %33 : vector<8x128xf32>
    %cst_13 = arith.constant 1.000000e+00 : f32
    %37 = vector.broadcast %cst_13 : f32 to vector<8x128xf32>
    %38 = arith.subf %36, %37 : vector<8x128xf32>
    %cst_14 = arith.constant 1.67326319 : f32
    %39 = vector.broadcast %cst_14 : f32 to vector<8x128xf32>
    %40 = arith.mulf %39, %38 : vector<8x128xf32>
    %41 = arith.select %35, %33, %40 : vector<8x128xi1>, vector<8x128xf32>
    %cst_15 = arith.constant 1.05070102 : f32
    %42 = vector.broadcast %cst_15 : f32 to vector<8x128xf32>
    %43 = arith.mulf %42, %41 : vector<8x128xf32>
    %44 = vector.extract_strided_slice %0 {offsets = [0, 0], sizes = [4, 128], strides = [1, 1]} : vector<8x128xf32> to vector<4x128xf32>
    %45 = tpu.concatenate %44, %43 in 0 : vector<4x128xf32>, vector<8x128xf32> -> vector<12x128xf32>
    %c0_16 = arith.constant 0 : index
    %c0_17 = arith.constant 0 : index
    %46 = vector.load %arg3[%c0_16, %c0_17] : memref<12x128xf32, #tpu.memory_space<vmem>>, vector<12x128xf32>
    tpu.vector_store %arg3[%c0_16, %c0_17], %45 {strides = array<i32>} : memref<12x128xf32, #tpu.memory_space<vmem>>, vector<12x128xf32>,
    return
  }
}

</mosaic_0001>

<bundles_post_ra>
// kernel: tpu_custom_call.1
= control target key start
LH: loop header
LB: loop body
LE: loop exit
PB: predicated region body
PF: predicated region fallthrough
CT: control target
= control target key end

     0   :  { %8 = vsyncpa [#allocation3], 0  ;;  %s311_s0 = inlined_call_operand.vmem [shape: f32[8,128], index: 0, kind: input, shape index: {}]   ;;  %s312_s1 = inlined_call_operand.hbm [shape: f32[8,24], index: 1, kind: input, shape index: {}]   ;;  %s313_s2 = inlined_call_operand.vmem [shape: f32[8,1], index: 2, kind: input, shape index: {}]   ;;  %s314_s3 = inlined_call_operand.hbm [shape: f32[12,128], index: 3, kind: output, shape index: {}]  }
   0x1   :  { %9 = vsyncpa [#allocation4], 0  ;;  %s250_s12 = smov [#allocation2]   ;;  %s202_s16 = scalar_lea.hbm %s312_s1, 128 }
   0x2   :  { %s18_s13 = sshll.u32 %s250_s12, 4  ;;  %p203_p0 = scmp.ne.s32.totalorder %s312_s1, %s202_s16  ;;  %s19_s13 = int_to_ptr.vmem [resolvable:$true] %s18_s13 }
   0x3   :  { %p206_p1 = scmp.lt.u32.totalorder %s202_s16, %s312_s1 }
   0x5   :  { %p208_p2 = pnand %p206_p1, %p203_p0 }
   0x7   :  { %211 = shalt.err (!%p208_p2)
}
   0x8   :  { %s212_s21 = scalar_lea.vmem %s19_s13, 128  ;;  %p217_p4 = scmp.lt.s32.totalorder %s19_s13, %s19_s13 }
   0x9   :  { %p213_p3 = scmp.ne.s32.totalorder %s19_s13, %s212_s21  ;;  %p218_p5 = scmp.lt.s32.totalorder %s212_s21, %s212_s21 }
   0xb   :  { %p219_p6 = por %p218_p5, %p217_p4 }
   0xd   :  { %p220_p7 = pnand %p219_p6, %p213_p3 }
   0xf   :  { %223 = shalt.err (!%p220_p7)
}
  0x10   :  { %21 = dma.hbm_to_vmem [thread:$0]  %s312_s1, 128, %s19_s13, [#allocation3]  }
  0x11   :  { %246 = dma.done.wait [#allocation3], 128  }
  0x12   :  { %247 = vsyncadd [#allocation3], 4294967168  ;;  %v251_v0 = vmov 0.0|0.0   ;;  %vm252_vm0 = vmmov 0   ;;  %v253_v1 = vmov 0.0   ;;  %v254_v2 = vmov 0  }
  0x13   :  { %183 = vmatprep.subr.bf16.mxu0 %v251_v0  ;;  %180 = vmatprep.mubr.msk.f32.mxu0 %vm252_vm0, %v253_v1  ;;  %v27_v3 = vld [vmem:[%s311_s0] sm:$0xff]  ;;  %s255_s26 = smov 1   ;;  %s256_s1 = smov 127   ;;  %v28_v5 = vlaneseq  ;;  %vm257_vm2 = vmmov 1   ;;  %vm57_vm5 = vcmask 195584   ;;  %vm141_vm7 = vcmask 1043456  }
  0x14   :  { %198 = vset.pattern.permute.xlu1 %v254_v2  ;;  %199 = vset.pattern.permute.xlu0 %v254_v2  ;;  %v51_v4 = vld [vmem:[%s313_s2] sm:$0xff]  ;;  %s258_s0 = smov [#allocation5]  }
  0x15   :  { %43 = vrot.lane.b32.xlu0 %v27_v3, %s255_s26  ;;  %54 = vperm.xlu1 %198, %v51_v4   ;;  %v29_v6 = vand.u32 127, %v28_v5  ;;  %v50_v11 = vld [vmem:[#allocation2] sm:$0xff]  ;;  %s150_s2 = sshll.u32 %s258_s0, 4  ;;  %s151_s2 = int_to_ptr.vmem [resolvable:$true] %s150_s2 }
  0x16   :  { %s224_s29 = scalar_lea.vmem %s151_s2, 256  ;;  %p229_p9 = scmp.lt.s32.totalorder %s151_s2, %s151_s2 }
  0x17   :  { %v34_v7 = vand.u32 15, %v29_v6  ;;  %p225_p8 = scmp.ne.s32.totalorder %s151_s2, %s224_s29  ;;  %p230_p10 = scmp.lt.s32.totalorder %s224_s29, %s224_s29 }
  0x19   :  { %47 = vrot.lane.b32.xlu0 %v27_v3, %s256_s1  ;;  %vm168_vm1 = vcmp.ne.s32.totalorder %v34_v7, 0  ;;  %vm169_vm4 = vcmp.ne.s32.totalorder %v34_v7, 15  ;;  %p231_p11 = por %p230_p10, %p229_p9 }
  0x1a   :  { %vm185_vm3 = vmpackc.low %vm257_vm2, %vm168_vm1 }
  0x1b   :  { %p232_p12 = pnand %p231_p11, %p225_p8 }
  0x87   :  { %v44_v8 = vpop.permute.xlu0 %43 }
  0x88   :  { %v184_v9 = vpack.c.bf16 %v27_v3, %v44_v8 }
  0x8a   :  { %186 = vmatpush3.bf16.msk.msra.mxu0 %vm185_vm3, %v184_v9 }
  0x8b   :  { %178 = vmatprep.subr.mxu0 %v253_v1  ;;  %v48_v10 = vpop.permute.xlu0 %47 }
  0x8e   :  { %179 = vmatpush3.msk.msra.mxu0 %vm169_vm4, %v48_v10 }
  0x8f   :  { %181 = vmatmul.mubr.msk.f32.vlgmr.msra.gmra.mrb[0].mxu0 %vm57_vm5, %v50_v11 }
  0x94   :  { %v55_v12 = vpop.permute.xlu1 %54 }
 0x162   :  { %v127_v13 = vpop.f32.mrb[0].mxu0 }
 0x163   :  { %v128_v14 = vadd.f32 %v127_v13, %v55_v12  ;;  %v182_v15 = vpop.f32.mrb[1].mxu0 }
 0x165   :  { %v132_v16 = vmul.f32 1.442695, %v128_v14  ;;  %vm131_vm6 = vcmp.gt.f32.partialorder %v128_v14, 0.0 }
 0x167   :  { %200 = vpow2.f32 %v132_v16 }
 0x171   :  { %v201_v17 = vpop.eup %200 }
 0x172   :  { %v167_v18 = vadd.f32 -1.0, %v201_v17 }
 0x174   :  { %v135_v19 = vmul.f32 1.6732632, %v167_v18 }
 0x176   :  { %v136_v20 = vsel %vm131_vm6, %v128_v14, %v135_v19 }
 0x177   :  { %v137_v21 = vmul.f32 1.050701, %v136_v20 }
 0x179   :  { %v139_v22 = vrot.slane %v137_v21, 4 }
 0x17b   :  { %144 = vst [vmem:[#allocation5 + $0x8] sm:$0xf] %v139_v22  ;;  %v142_v23 = vsel %vm141_vm7, %v27_v3, %v139_v22 }
 0x17c   :  { %143 = vst [vmem:[#allocation5] sm:$0xff] %v142_v23 }
 0x17d   :  { %235 = shalt.err (!%p232_p12)
}
 0x17e   :  { %s236_s5 = scalar_lea.hbm %s314_s3, 256 }
 0x17f   :  { %p237_p13 = scmp.ne.s32.totalorder %s314_s3, %s236_s5  ;;  %p240_p0 = scmp.lt.u32.totalorder %s236_s5, %s314_s3 }
 0x181   :  { %p242_p1 = pnand %p240_p0, %p237_p13 }
 0x183   :  { %245 = shalt.err (!%p242_p1)
}
 0x184   :  { %s259_s10 = smov 128   ;;  %s260_s11 = smov 8  }
 0x185   :  { %156 = dma.vmem_to_hbm [thread:$0]  %s151_s2, 256, %s314_s3, [#allocation4], %s259_s10, %s259_s10, %s260_s11  }
 0x186   :  { %248 = dma.done.wait [#allocation4], 256  }
 0x187   :  { %249 = vsyncadd [#allocation4], 4294967040 }
 0x188   :  { %160 = vsyncpa [#allocation3], 1 }
 0x189   :  { %161 = vsyncpa [#allocation4], 1 }

</bundles_post_ra>
